<compile_context>
chip_gen: v7x
topology: tpu7x:2x2x1
jax: 0.10.0
libtpu: 0.0.40
codegen_flags: <defaults>
</compile_context>

<pallas_src>
import jax
import jax.numpy as jnp
from jax.experimental import pallas as pl
from jax.experimental.pallas import tpu as pltpu

LANE = 128


# ----------------------------- Pallas kernel --------------------------------
def gcn_kernel(a_ref, x_ref, w1_ref, w2_ref, wc_ref, b_ref, out_ref):
    a = a_ref[...]                      # (GN, GN) bf16 block-diagonal normalized adjacency
    x = x_ref[...]                      # (GN, 1)  f32 node features (F_in == 1)

    b1 = b_ref[0:1, :]                  # (1, HP) f32, nonzero in lanes [0:H)
    b2 = b_ref[1:2, :]                  # (1, HP) f32, nonzero in lanes [0:H)
    bc = b_ref[2:3, :]                  # (1, HP) f32, nonzero in lanes [H:H+C)

    # ---- GCNConv 1: A_hat @ (X @ W1) + b1, ReLU ----
    # F_in == 1, so X @ W1 is an exact (GN,1)*(1,HP) broadcast multiply.
    xw1 = (x * w1_ref[...]).astype(jnp.bfloat16)                          # (GN, HP)
    h1 = jnp.dot(a, xw1, preferred_element_type=jnp.float32) + b1
    h1 = jnp.maximum(h1, 0.0)

    # ---- GCNConv 2: A_hat @ (H1 @ W2) + b2, ReLU ----
    hw2 = jnp.dot(h1.astype(jnp.bfloat16), w2_ref[...],
                  preferred_element_type=jnp.float32).astype(jnp.bfloat16)
    h2 = jnp.dot(a, hw2, preferred_element_type=jnp.float32) + b2
    h2 = jnp.maximum(h2, 0.0)           # (GN, HP) f32; lanes [0:H) == embeddings, rest 0

    # ---- Linear classifier mapped into lanes [H:H+C); merge emb + logits ----
    logits = jnp.dot(h2.astype(jnp.bfloat16), wc_ref[...],
                     preferred_element_type=jnp.float32) + bc            # lanes [H:H+C)
    out_ref[...] = h2 + logits          # one lane-dense store: emb | logits | zeros


# ------------------------------- Wrappers ------------------------------------
def prepare_params(w1, b1, w2, b2, wc, bc):
    """Pad/pack parameters once (hoisted out of the per-call path).

    Hidden features occupy lanes [0:H), classes occupy lanes [H:H+C) of a single
    128-lane slab. Zero padding is exact through matmul + bias + ReLU.
    """
    f_in, h = w1.shape
    c = wc.shape[1]
    hp = LANE
    assert h + c <= hp, "hidden_dim + num_classes must fit in one 128-lane slab"
    w1p = jnp.zeros((f_in, hp), jnp.float32).at[:, :h].set(w1)
    w2p = jnp.zeros((hp, hp), jnp.float32).at[:h, :h].set(w2).astype(jnp.bfloat16)
    wcp = jnp.zeros((hp, hp), jnp.float32).at[:h, h:h + c].set(wc).astype(jnp.bfloat16)
    biases = jnp.zeros((3, hp), jnp.float32)
    biases = biases.at[0, :h].set(b1.reshape(-1))
    biases = biases.at[1, :h].set(b2.reshape(-1))
    biases = biases.at[2, h:h + c].set(bc.reshape(-1))
    return w1p, w2p, wcp, biases


def make_gcn_forward(hidden_dim, num_classes, graphs_per_step=4):
    H, C, G, HP = hidden_dim, num_classes, graphs_per_step, LANE

    @jax.jit
    def forward(a_hat_b, x_b, w1p, w2p, wcp, biases):
        B, N, F_in = x_b.shape
        # Pad batch to a multiple of G with empty graphs (all-zero A rows are
        # harmless; their outputs are discarded below).
        Bp = ((B + G - 1) // G) * G
        if Bp != B:
            a_hat_b = jnp.concatenate(
                [a_hat_b, jnp.zeros((Bp - B, N, N), a_hat_b.dtype)], axis=0)
            x_b = jnp.concatenate(
                [x_b, jnp.zeros((Bp - B, N, F_in), x_b.dtype)], axis=0)
        NB, GN = Bp // G, G * N

        # Block-diagonal A_hat slab per grid step (G graphs -> one GN x GN tile).
        a_r = a_hat_b.reshape(NB, G, N, N).astype(jnp.float32)
        eye_g = jnp.eye(G, dtype=jnp.float32)
        a_slab = jnp.einsum('bgij,gh->bgihj', a_r, eye_g).reshape(NB, GN, GN)
        a_slab = a_slab.astype(jnp.bfloat16)
        x_slab = x_b.reshape(NB, GN, F_in).astype(jnp.float32)

        out_slab = pl.pallas_call(
            gcn_kernel,
            out_shape=jax.ShapeDtypeStruct((NB, GN, HP), jnp.float32),
            grid_spec=pltpu.PrefetchScalarGridSpec(
                num_scalar_prefetch=0,
                grid=(NB,),
                in_specs=[
                    pl.BlockSpec((None, GN, GN), lambda b: (b, 0, 0)),     # A_hat slab
                    pl.BlockSpec((None, GN, F_in), lambda b: (b, 0, 0)),   # X slab
                    pl.BlockSpec((F_in, HP), lambda b: (0, 0)),            # W1 (shared)
                    pl.BlockSpec((HP, HP), lambda b: (0, 0)),              # W2 (shared)
                    pl.BlockSpec((HP, HP), lambda b: (0, 0)),              # Wc (shared)
                    pl.BlockSpec((3, HP), lambda b: (0, 0)),               # packed biases
                ],
                out_specs=pl.BlockSpec((None, GN, HP), lambda b: (b, 0, 0)),
            ),
            compiler_params=pltpu.CompilerParams(
                dimension_semantics=("parallel",),   # split slabs across TCs (megacore)
            ),
        )(a_slab, x_slab, w1p, w2p, wcp, biases)

        # Layout plumbing only: split the merged slab back into logits / embeddings.
        out = out_slab.reshape(Bp, N, HP)[:B]
        logits = out[..., H:H + C]
        embeddings = out[..., :H]
        return logits, embeddings

    return forward


# ------------------------------- JAX glue ------------------------------------
def build_norm_adj(edge_index, num_nodes):
    """Dense D^{-1/2}(A+I)D^{-1/2}, matching PyG GCNConv default normalization."""
    src, dst = edge_index[0], edge_index[1]
    a = jnp.zeros((num_nodes, num_nodes), jnp.float32)
    a = a.at[dst, src].add(1.0)                      # message src -> dst
    a = a + jnp.eye(num_nodes, dtype=jnp.float32)    # self loops
    deg = a.sum(axis=1)
    dinv = jnp.where(deg > 0.0, 1.0 / jnp.sqrt(deg), 0.0)
    return dinv[:, None] * a * dinv[None, :]


def glorot(key, shape):
    fan_in, fan_out = shape
    lim = jnp.sqrt(6.0 / (fan_in + fan_out))
    return jax.random.uniform(key, shape, jnp.float32, -lim, lim)


if __name__ == "__main__":
    # Small, deterministic synthetic problem consistent with the module:
    # num_features = 1 ('avg_normalized_volume'), hidden_dim = 32, num_classes = 2.
    # B=16 graphs, G=4 graphs per grid step -> grid of 4 block-diagonal 128x128 slabs.
    B, num_nodes, num_features, hidden_dim, num_classes, num_edges = 16, 32, 1, 32, 2, 64

    key = jax.random.PRNGKey(0)
    k_x, k_e, k_w1, k_w2, k_wc, k_bc = jax.random.split(key, 6)

    # Per-graph node features and edge_index (like data.x, data.edge_index).
    x_b = jax.random.normal(k_x, (B, num_nodes, num_features), jnp.float32)
    edge_keys = jax.random.split(k_e, 2 * B)
    a_hat_b = jnp.stack([
        build_norm_adj(jnp.stack([
            jax.random.randint(edge_keys[2 * g], (num_edges,), 0, num_nodes),
            jax.random.randint(edge_keys[2 * g + 1], (num_edges,), 0, num_nodes),
        ]), num_nodes)
        for g in range(B)
    ])                                                 # [B, N, N]

    # Deterministic parameter init (shapes from GCN.__init__), shared across graphs.
    w1 = glorot(k_w1, (num_features, hidden_dim))
    b1 = jnp.zeros((1, hidden_dim), jnp.float32)
    w2 = glorot(k_w2, (hidden_dim, hidden_dim))
    b2 = jnp.zeros((1, hidden_dim), jnp.float32)
    wc = glorot(k_wc, (hidden_dim, num_classes))
    bc = jax.random.uniform(k_bc, (1, num_classes), jnp.float32,
                            -1.0 / jnp.sqrt(hidden_dim), 1.0 / jnp.sqrt(hidden_dim))

    params = prepare_params(w1, b1, w2, b2, wc, bc)            # pad/pack once
    gcn_forward = make_gcn_forward(hidden_dim, num_classes, graphs_per_step=4)

    logits, embeddings = gcn_forward(a_hat_b, x_b, *params)
    jax.block_until_ready((logits, embeddings))
    assert logits.shape == (B, num_nodes, num_classes)
    assert embeddings.shape == (B, num_nodes, hidden_dim)

    # (1) Pure-JAX f32 module reference; loose tolerance since the kernel uses
    #     bf16 MXU operands (f32 accumulation).
    h1_ref = jnp.maximum(jnp.einsum('bij,bjh->bih', a_hat_b,
                                    jnp.einsum('bjf,fh->bjh', x_b, w1)) + b1, 0.0)
    h2_ref = jnp.maximum(jnp.einsum('bij,bjh->bih', a_hat_b,
                                    jnp.einsum('bjh,hk->bjk', h1_ref, w2)) + b2, 0.0)
    logits_ref = jnp.einsum('bjh,hc->bjc', h2_ref, wc) + bc
    assert jnp.allclose(embeddings, h2_ref, atol=1e-1, rtol=1e-1)
    assert jnp.allclose(logits, logits_ref, atol=1e-1, rtol=1e-1)

    # (2) Tighter check against a reference that emulates the kernel's bf16 MXU
    #     inputs (f32 accumulation), isolating layout/packing correctness.
    def bf(v):
        return v.astype(jnp.bfloat16).astype(jnp.float32)

    xw1_q = bf(jnp.einsum('bjf,fh->bjh', x_b, w1))
    h1_q = jnp.maximum(jnp.einsum('bij,bjh->bih', bf(a_hat_b), xw1_q) + b1, 0.0)
    hw2_q = bf(jnp.einsum('bjh,hk->bjk', bf(h1_q), bf(w2)))
    h2_q = jnp.maximum(jnp.einsum('bij,bjh->bih', bf(a_hat_b), hw2_q) + b2, 0.0)
    logits_q = jnp.einsum('bjh,hc->bjc', bf(h2_q), bf(wc)) + bc
    assert jnp.allclose(embeddings, h2_q, atol=2e-2, rtol=2e-2)
    assert jnp.allclose(logits, logits_q, atol=2e-2, rtol=2e-2)

    print("KERNEL_OK")
</pallas_src>

<mosaic_0001>
module attributes {stable_mosaic.version = 11 : i64} {
  func.func @gcn_kernel(%arg0: i32, %arg1: memref<1x128x128xbf16, #tpu.memory_space<vmem>>, %arg2: memref<1x128x1xf32, #tpu.memory_space<vmem>>, %arg3: memref<1x128xf32, #tpu.memory_space<vmem>>, %arg4: memref<128x128xbf16, #tpu.memory_space<vmem>>, %arg5: memref<128x128xbf16, #tpu.memory_space<vmem>>, %arg6: memref<3x128xf32, #tpu.memory_space<vmem>>, %arg7: memref<1x128x128xf32, #tpu.memory_space<vmem>>) attributes {dimension_semantics = [#tpu.dimension_semantics<parallel>], iteration_bounds = array<i64: 4>, scalar_prefetch = 0 : i64, scratch_operands = 0 : i64, tpu.core_type = #tpu.core_type<tc>, window_params = [{transform_indices = @transform_0, window_bounds = array<i64: 1, 128, 128>}, {transform_indices = @transform_1, window_bounds = array<i64: 1, 128, 1>}, {pipeline_mode = #tpu.pipeline_mode<synchronous>, transform_indices = @transform_2, window_bounds = array<i64: 1, 128>}, {pipeline_mode = #tpu.pipeline_mode<synchronous>, transform_indices = @transform_3, window_bounds = array<i64: 128, 128>}, {pipeline_mode = #tpu.pipeline_mode<synchronous>, transform_indices = @transform_4, window_bounds = array<i64: 128, 128>}, {pipeline_mode = #tpu.pipeline_mode<synchronous>, transform_indices = @transform_5, window_bounds = array<i64: 3, 128>}, {transform_indices = @transform_6, window_bounds = array<i64: 1, 128, 128>}]} {
    %c0 = arith.constant 0 : index
    %c0_0 = arith.constant 0 : index
    %c0_1 = arith.constant 0 : index
    %0 = vector.load %arg1[%c0, %c0_0, %c0_1] : memref<1x128x128xbf16, #tpu.memory_space<vmem>>, vector<1x128x128xbf16>
    %1 = vector.shape_cast %0 : vector<1x128x128xbf16> to vector<128x128xbf16>
    %c0_2 = arith.constant 0 : index
    %c0_3 = arith.constant 0 : index
    %c0_4 = arith.constant 0 : index
    %2 = vector.load %arg2[%c0_2, %c0_3, %c0_4] : memref<1x128x1xf32, #tpu.memory_space<vmem>>, vector<1x128x1xf32>
    %3 = vector.shape_cast %2 : vector<1x128x1xf32> to vector<128x1xf32>
    %c0_5 = arith.constant 0 : index
    %c0_6 = arith.constant 0 : index
    %4 = vector.load %arg6[%c0_5, %c0_6] : memref<3x128xf32, #tpu.memory_space<vmem>>, vector<1x128xf32>
    %c1 = arith.constant 1 : index
    %c0_7 = arith.constant 0 : index
    %5 = vector.load %arg6[%c1, %c0_7] : memref<3x128xf32, #tpu.memory_space<vmem>>, vector<1x128xf32>
    %c2 = arith.constant 2 : index
    %c0_8 = arith.constant 0 : index
    %6 = vector.load %arg6[%c2, %c0_8] : memref<3x128xf32, #tpu.memory_space<vmem>>, vector<1x128xf32>
    %c0_9 = arith.constant 0 : index
    %c0_10 = arith.constant 0 : index
    %7 = vector.load %arg3[%c0_9, %c0_10] : memref<1x128xf32, #tpu.memory_space<vmem>>, vector<1x128xf32>
    %8 = vector.broadcast %3 : vector<128x1xf32> to vector<128x128xf32>
    %9 = vector.broadcast %7 : vector<1x128xf32> to vector<128x128xf32>
    %10 = arith.mulf %8, %9 : vector<128x128xf32>
    %11 = arith.truncf %10 : vector<128x128xf32> to vector<128x128xbf16>
    %cst = arith.constant dense<0.000000e+00> : vector<128x128xf32>
    %12 = tpu.matmul %1, %11, %cst {dimension_numbers = #tpu.dot_dimension_numbers<[1], [0], [0], [1], [0, 0, 1, 1], [], []>} : vector<128x128xbf16>, vector<128x128xbf16>, vector<128x128xf32> -> vector<128x128xf32>
    %13 = vector.broadcast %4 : vector<1x128xf32> to vector<128x128xf32>
    %14 = arith.addf %12, %13 : vector<128x128xf32>
    %cst_11 = arith.constant 0.000000e+00 : f32
    %15 = vector.broadcast %cst_11 : f32 to vector<128x128xf32>
    %16 = arith.maximumf %14, %15 : vector<128x128xf32>
    %17 = arith.truncf %16 : vector<128x128xf32> to vector<128x128xbf16>
    %c0_12 = arith.constant 0 : index
    %c0_13 = arith.constant 0 : index
    %18 = vector.load %arg4[%c0_12, %c0_13] : memref<128x128xbf16, #tpu.memory_space<vmem>>, vector<128x128xbf16>
    %cst_14 = arith.constant dense<0.000000e+00> : vector<128x128xf32>
    %19 = tpu.matmul %17, %18, %cst_14 {dimension_numbers = #tpu.dot_dimension_numbers<[1], [0], [0], [1], [0, 0, 1, 1], [], []>} : vector<128x128xbf16>, vector<128x128xbf16>, vector<128x128xf32> -> vector<128x128xf32>
    %20 = arith.truncf %19 : vector<128x128xf32> to vector<128x128xbf16>
    %cst_15 = arith.constant dense<0.000000e+00> : vector<128x128xf32>
    %21 = tpu.matmul %1, %20, %cst_15 {dimension_numbers = #tpu.dot_dimension_numbers<[1], [0], [0], [1], [0, 0, 1, 1], [], []>} : vector<128x128xbf16>, vector<128x128xbf16>, vector<128x128xf32> -> vector<128x128xf32>
    %22 = vector.broadcast %5 : vector<1x128xf32> to vector<128x128xf32>
    %23 = arith.addf %21, %22 : vector<128x128xf32>
    %cst_16 = arith.constant 0.000000e+00 : f32
    %24 = vector.broadcast %cst_16 : f32 to vector<128x128xf32>
    %25 = arith.maximumf %23, %24 : vector<128x128xf32>
    %26 = arith.truncf %25 : vector<128x128xf32> to vector<128x128xbf16>
    %c0_17 = arith.constant 0 : index
    %c0_18 = arith.constant 0 : index
    %27 = vector.load %arg5[%c0_17, %c0_18] : memref<128x128xbf16, #tpu.memory_space<vmem>>, vector<128x128xbf16>
    %cst_19 = arith.constant dense<0.000000e+00> : vector<128x128xf32>
    %28 = tpu.matmul %26, %27, %cst_19 {dimension_numbers = #tpu.dot_dimension_numbers<[1], [0], [0], [1], [0, 0, 1, 1], [], []>} : vector<128x128xbf16>, vector<128x128xbf16>, vector<128x128xf32> -> vector<128x128xf32>
    %29 = vector.broadcast %6 : vector<1x128xf32> to vector<128x128xf32>
    %30 = arith.addf %28, %29 : vector<128x128xf32>
    %31 = arith.addf %25, %30 : vector<128x128xf32>
    %c0_20 = arith.constant 0 : index
    %c0_21 = arith.constant 0 : index
    %c0_22 = arith.constant 0 : index
    %32 = vector.load %arg7[%c0_20, %c0_21, %c0_22] : memref<1x128x128xf32, #tpu.memory_space<vmem>>, vector<1x128x128xf32>
    %33 = vector.shape_cast %32 : vector<1x128x128xf32> to vector<128x128xf32>
    %34 = vector.shape_cast %31 : vector<128x128xf32> to vector<1x128x128xf32>
    tpu.vector_store %arg7[%c0_20, %c0_21, %c0_22], %34 {strides = array<i32>} : memref<1x128x128xf32, #tpu.memory_space<vmem>>, vector<1x128x128xf32>,
    return
  }
  func.func @transform_0(%arg0: i32) -> (i32, i32, i32) {
    %c0_i32 = arith.constant 0 : i32
    %c0_i32_0 = arith.constant 0 : i32
    %c0_i32_1 = arith.constant 0 : i32
    return %arg0, %c0_i32, %c0_i32_0 : i32, i32, i32
  }
  func.func @transform_1(%arg0: i32) -> (i32, i32, i32) {
    %c0_i32 = arith.constant 0 : i32
    %c0_i32_0 = arith.constant 0 : i32
    %c0_i32_1 = arith.constant 0 : i32
    return %arg0, %c0_i32, %c0_i32_0 : i32, i32, i32
  }
  func.func @transform_2(%arg0: i32) -> (i32, i32) {
    %c0_i32 = arith.constant 0 : i32
    %c0_i32_0 = arith.constant 0 : i32
    %c0_i32_1 = arith.constant 0 : i32
    return %c0_i32, %c0_i32_0 : i32, i32
  }
  func.func @transform_3(%arg0: i32) -> (i32, i32) {
    %c0_i32 = arith.constant 0 : i32
    %c0_i32_0 = arith.constant 0 : i32
    %c0_i32_1 = arith.constant 0 : i32
    return %c0_i32, %c0_i32_0 : i32, i32
  }
  func.func @transform_4(%arg0: i32) -> (i32, i32) {
    %c0_i32 = arith.constant 0 : i32
    %c0_i32_0 = arith.constant 0 : i32
    %c0_i32_1 = arith.constant 0 : i32
    return %c0_i32, %c0_i32_0 : i32, i32
  }
  func.func @transform_5(%arg0: i32) -> (i32, i32) {
    %c0_i32 = arith.constant 0 : i32
    %c0_i32_0 = arith.constant 0 : i32
    %c0_i32_1 = arith.constant 0 : i32
    return %c0_i32, %c0_i32_0 : i32, i32
  }
  func.func @transform_6(%arg0: i32) -> (i32, i32, i32) {
    %c0_i32 = arith.constant 0 : i32
    %c0_i32_0 = arith.constant 0 : i32
    %c0_i32_1 = arith.constant 0 : i32
    return %arg0, %c0_i32, %c0_i32_0 : i32, i32, i32
  }
}

</mosaic_0001>

<bundles_post_ra>
// kernel: forward.1
= control target key start
LH: loop header
LB: loop body
LE: loop exit
PB: predicated region body
PF: predicated region fallthrough
CT: control target
= control target key end

     0   :  { %s1465_s21 = smov 0   ;;  %s1709_s0 = inlined_call_operand.vmem [shape: bf16[4,128,128], index: 0, kind: input, shape index: {}]   ;;  %s1710_s1 = inlined_call_operand.vmem [shape: f32[4,128,1], index: 1, kind: input, shape index: {}]   ;;  %s1711_s2 = inlined_call_operand.vmem [shape: f32[1,128], index: 2, kind: input, shape index: {}]   ;;  %s1712_s3 = inlined_call_operand.vmem [shape: bf16[128,128], index: 3, kind: input, shape index: {}]   ;;  %s1713_s4 = inlined_call_operand.vmem [shape: bf16[128,128], index: 4, kind: input, shape index: {}]   ;;  %s1714_s5 = inlined_call_operand.vmem [shape: f32[3,128], index: 5, kind: input, shape index: {}]   ;;  %s1715_s6 = inlined_call_operand.vmem [shape: f32[4,128,128], index: 6, kind: output, shape index: {}]  }
   0x1 LB: > { %s1150_s22 = sadd.s32 4294967295, %s1427_s21   ;;  %p1154_p0 = scmp.ge.s32.totalorder %s1427_s21, 1  ;;  %s1427_s21 = sphi %s1465_s21, %s16_s21  }
   0x2   : > { %p222_p1 = scmp.lt.s32.totalorder %s1427_s21, 5 }
   0x4   : > { %p223_p2 = pnand %p1154_p0, %p222_p1 }
   0x5   : > { %p257_p3 = scmp.lt.s32.totalorder (!%p223_p2), %s1150_s22, 3  ;;  %v1429_v0 = vmov (!%p223_p2), 0   ;;  %v1405_v18 = vld [vmem:[%s1712_s3] sm:$0xff] (!%p223_p2)   ;;  %v1406_v19 = vld [vmem:[%s1712_s3 + $0x8] sm:$0xff] (!%p223_p2)   ;;  %v1407_v20 = vld [vmem:[%s1712_s3 + $0x10] sm:$0xff] (!%p223_p2)  }
   0x6   : > { %226 = sbr.rel (%p223_p2) target bundleno = 1122 (0x462), region = 44  ;;  %1396 = vset.pattern.permute.xlu1 (!%p223_p2), %v1429_v0  ;;  %1395 = vset.pattern.permute.xlu0 (!%p223_p2), %v1429_v0  ;;  %v1408_v21 = vld [vmem:[%s1712_s3 + $0x18] sm:$0xff] (!%p223_p2)   ;;  %v1409_v22 = vld [vmem:[%s1712_s3 + $0x20] sm:$0xff] (!%p223_p2)   ;;  %v1410_v23 = vld [vmem:[%s1712_s3 + $0x28] sm:$0xff] (!%p223_p2)  }
   0x7   : > { %1290 = vmatprep.subr.bf16.mxu1 (!%p223_p2), %v1405_v18  ;;  %v1161_v26 = vld [vmem:[%s1711_s2] ss:$0 sm:$0xff] (!%p223_p2) }
   0x8   : > { %1291 = vmatpush3.bf16.msra.mxu1 (!%p223_p2), %v1405_v18 }
   0x9   : > { %1292 = vmatprep.subr.bf16.mxu1 (!%p223_p2), %v1406_v19 }
   0xc   : > { %1293 = vmatpush3.bf16.msra.mxu1 (!%p223_p2), %v1406_v19 }
   0xd   : > { %s1717_s22 = smov (!%p257_p3, %s1150_s22), 3  ;;  %1294 = vmatprep.subr.bf16.mxu1 %v1407_v20 }
   0xe   : > { %s1192_s23 = sshll.u32 %s1717_s22, 7  ;;  %s1191_s27 = sshll.u32 %s1717_s22, 6 }
   0xf   : > { %s266_s26 = scalar_lea.vmem %s1710_s1, %s1192_s23  ;;  %s1485_s30 = scalar_lea.vmem %s1709_s0, %s1191_s27 }
  0x10   : > { %v291_v1 = vld [vmem:[%s266_s26 + $0x10] sm:$0xff]  ;;  %v289_v2 = vld [vmem:[%s266_s26] sm:$0xff]  ;;  %v292_v3 = vld [vmem:[%s266_s26 + $0x18] sm:$0xff]  ;;  %1295 = vmatpush3.bf16.msra.mxu1 %v1407_v20  ;;  %s1664_s7 = scalar_lea.vmem %s1715_s6, %s1192_s23 }
  0x11   : > { %321 = vperm.xlu1 %1396, %v291_v1   ;;  %311 = vperm.xlu0 %1395, %v289_v2   ;;  %v290_v4 = vld [vmem:[%s266_s26 + $0x8] sm:$0xff]  ;;  %v293_v6 = vld [vmem:[%s266_s26 + $0x20] sm:$0xff]  ;;  %v296_v7 = vld [vmem:[%s266_s26 + $0x38] sm:$0xff] }
  0x12   : > { %v294_v5 = vld [vmem:[%s266_s26 + $0x28] sm:$0xff]  ;;  %v295_v8 = vld [vmem:[%s266_s26 + $0x30] sm:$0xff]  ;;  %v297_v10 = vld [vmem:[%s266_s26 + $0x40] sm:$0xff]  ;;  %1296 = vmatprep.subr.bf16.mxu1 %v1408_v21 }
  0x13   : > { %v298_v9 = vld [vmem:[%s266_s26 + $0x48] sm:$0xff]  ;;  %v300_v11 = vld [vmem:[%s266_s26 + $0x58] sm:$0xff]  ;;  %v299_v12 = vld [vmem:[%s266_s26 + $0x50] sm:$0xff] }
  0x14   : > { %v302_v13 = vld [vmem:[%s266_s26 + $0x68] sm:$0xff]  ;;  %v301_v14 = vld [vmem:[%s266_s26 + $0x60] sm:$0xff]  ;;  %v304_v15 = vld [vmem:[%s266_s26 + $0x78] sm:$0xff]  ;;  %1297 = vmatpush3.bf16.msra.mxu1 %v1408_v21 }
  0x15   : > { %326 = vperm.xlu1 %1396, %v292_v3   ;;  %316 = vperm.xlu0 %1395, %v290_v4   ;;  %v303_v16 = vld [vmem:[%s266_s26 + $0x70] sm:$0xff]  ;;  %v1488_v17 = vld [vmem:[%s1485_s30] sm:$0xff]   ;;  %v1513_v1 = vld [vmem:[%s1485_s30 + $0x8] sm:$0xff]  }
  0x16   : > { %1274 = vmatprep.mubr.bf16.mxu0 %v1488_v17  ;;  %1298 = vmatprep.subr.bf16.mxu1 %v1409_v22  ;;  %v1516_v2 = vld [vmem:[%s1485_s30 + $0x10] sm:$0xff]   ;;  %v1521_v3 = vld [vmem:[%s1485_s30 + $0x18] sm:$0xff]   ;;  %v1524_v4 = vld [vmem:[%s1485_s30 + $0x20] sm:$0xff]  }
  0x18   : > { %1299 = vmatpush3.bf16.msra.mxu1 %v1409_v22 }
  0x19   : > { %336 = vperm.xlu1 %1396, %v294_v5   ;;  %331 = vperm.xlu0 %1395, %v293_v6   ;;  %v1529_v5 = vld [vmem:[%s1485_s30 + $0x28] sm:$0xff]   ;;  %v1532_v6 = vld [vmem:[%s1485_s30 + $0x30] sm:$0xff]  }
  0x1a   : > { %1300 = vmatprep.subr.bf16.mxu1 %v1410_v23 }
  0x1c   : > { %1301 = vmatpush3.bf16.msra.mxu1 %v1410_v23 }
  0x1d   : > { %346 = vperm.xlu1 %1396, %v296_v7   ;;  %341 = vperm.xlu0 %1395, %v295_v8   ;;  %v1537_v7 = vld [vmem:[%s1485_s30 + $0x38] sm:$0xff]   ;;  %v1411_v8 = vld [vmem:[%s1712_s3 + $0x30] sm:$0xff]  }
  0x1e   : > { %1302 = vmatprep.subr.bf16.mxu1 %v1411_v8 }
  0x20   : > { %1303 = vmatpush3.bf16.msra.mxu1 %v1411_v8 }
  0x21   : > { %356 = vperm.xlu1 %1396, %v298_v9   ;;  %351 = vperm.xlu0 %1395, %v297_v10   ;;  %v1412_v9 = vld [vmem:[%s1712_s3 + $0x38] sm:$0xff]   ;;  %v1162_v10 = vld [vmem:[%s1714_s5] ss:$0 sm:$0xff] }
  0x22   : > { %1304 = vmatprep.subr.bf16.mxu1 %v1412_v9 }
  0x24   : > { %1305 = vmatpush3.bf16.msra.mxu1 %v1412_v9 }
  0x25   : > { %366 = vperm.xlu1 %1396, %v300_v11   ;;  %361 = vperm.xlu0 %1395, %v299_v12  }
  0x29   : > { %376 = vperm.xlu1 %1396, %v302_v13   ;;  %371 = vperm.xlu0 %1395, %v301_v14  }
  0x2d   : > { %386 = vperm.xlu1 %1396, %v304_v15   ;;  %381 = vperm.xlu0 %1395, %v303_v16  }
  0x90   : > { %v322_v24 = vpop.permute.xlu1 %321  ;;  %v312_v25 = vpop.permute.xlu0 %311 }
  0x91   : > { %v397_v29 = vmul.f32 %v1161_v26, %v322_v24  ;;  %v395_v30 = vmul.f32 %v1161_v26, %v312_v25 }
  0x94   : > { %v327_v27 = vpop.permute.xlu1 %326  ;;  %v317_v28 = vpop.permute.xlu0 %316 }
  0x95   : > { %v398_v31 = vmul.f32 %v1161_v26, %v327_v27  ;;  %v396_v32 = vmul.f32 %v1161_v26, %v317_v28 }
  0x97   : > { %v411_v33 = vpack.c.bf16 %v396_v32, %v395_v30  ;;  %v412_v36 = vpack.c.bf16 %v398_v31, %v397_v29 }
  0x98   : > { %v337_v34 = vpop.permute.xlu1 %336  ;;  %v332_v35 = vpop.permute.xlu0 %331 }
  0x99   : > { %v400_v37 = vmul.f32 %v1161_v26, %v337_v34  ;;  %v399_v38 = vmul.f32 %v1161_v26, %v332_v35  ;;  %1258 = vmatprep.subr.bf16.mxu0 %v411_v33 }
  0x9a   : > { %1259 = vmatpush3.bf16.msra.mxu0 %v411_v33 }
  0x9b   : > { %1260 = vmatprep.subr.bf16.mxu0 %v412_v36  ;;  %v413_v41 = vpack.c.bf16 %v400_v37, %v399_v38 }
  0x9c   : > { %v347_v39 = vpop.permute.xlu1 %346  ;;  %v342_v40 = vpop.permute.xlu0 %341 }
  0x9d   : > { %v402_v42 = vmul.f32 %v1161_v26, %v347_v39  ;;  %v401_v43 = vmul.f32 %v1161_v26, %v342_v40 }
  0x9e   : > { %1261 = vmatpush3.bf16.msra.mxu0 %v412_v36 }
  0x9f   : > { %1262 = vmatprep.subr.bf16.mxu0 %v413_v41  ;;  %v414_v46 = vpack.c.bf16 %v402_v42, %v401_v43 }
  0xa0   : > { %v357_v44 = vpop.permute.xlu1 %356  ;;  %v352_v45 = vpop.permute.xlu0 %351 }
  0xa1   : > { %v404_v47 = vmul.f32 %v1161_v26, %v357_v44  ;;  %v403_v48 = vmul.f32 %v1161_v26, %v352_v45 }
  0xa2   : > { %1263 = vmatpush3.bf16.msra.mxu0 %v413_v41 }
  0xa3   : > { %1264 = vmatprep.subr.bf16.mxu0 %v414_v46  ;;  %v415_v51 = vpack.c.bf16 %v404_v47, %v403_v48 }
  0xa4   : > { %v367_v49 = vpop.permute.xlu1 %366  ;;  %v362_v50 = vpop.permute.xlu0 %361 }
  0xa5   : > { %v406_v52 = vmul.f32 %v1161_v26, %v367_v49  ;;  %v405_v53 = vmul.f32 %v1161_v26, %v362_v50 }
  0xa6   : > { %1265 = vmatpush3.bf16.msra.mxu0 %v414_v46 }
  0xa7   : > { %1266 = vmatprep.subr.bf16.mxu0 %v415_v51  ;;  %v416_v56 = vpack.c.bf16 %v406_v52, %v405_v53 }
  0xa8   : > { %v377_v54 = vpop.permute.xlu1 %376  ;;  %v372_v55 = vpop.permute.xlu0 %371 }
  0xa9   : > { %v408_v57 = vmul.f32 %v1161_v26, %v377_v54  ;;  %v407_v58 = vmul.f32 %v1161_v26, %v372_v55 }
  0xaa   : > { %1267 = vmatpush3.bf16.msra.mxu0 %v415_v51 }
  0xab   : > { %1268 = vmatprep.subr.bf16.mxu0 %v416_v56  ;;  %v417_v61 = vpack.c.bf16 %v408_v57, %v407_v58 }
  0xac   : > { %v387_v59 = vpop.permute.xlu1 %386  ;;  %v382_v60 = vpop.permute.xlu0 %381 }
  0xad   : > { %v410_v62 = vmul.f32 %v1161_v26, %v387_v59  ;;  %v409_v63 = vmul.f32 %v1161_v26, %v382_v60 }
  0xae   : > { %1269 = vmatpush3.bf16.msra.mxu0 %v416_v56 }
  0xaf   : > { %1270 = vmatprep.subr.bf16.mxu0 %v417_v61  ;;  %v418_v0 = vpack.c.bf16 %v410_v62, %v409_v63 }
  0xb2   : > { %1271 = vmatpush3.bf16.msra.mxu0 %v417_v61 }
  0xb3   : > { %1272 = vmatprep.subr.bf16.mxu0 %v418_v0 }
  0xb6   : > { %1273 = vmatpush3.bf16.msra.mxu0 %v418_v0 }
  0xb9   : > { %1275 = vmatmul.mubr.bf16.vlgmr.msra.gmra.mrb[0].mxu0 %v1513_v1 }
  0xba   : > { %1278 = vmatprep.mubr.bf16.mxu0 %v1516_v2 }
  0xc1   : > { %1279 = vmatmul.mubr.bf16.gmra.mrb[4].mxu0 %v1521_v3 }
  0xc2   : > { %1282 = vmatprep.mubr.bf16.mxu0 %v1524_v4 }
  0xc9   : > { %1283 = vmatmul.mubr.bf16.gmra.mrb[8].mxu0 %v1529_v5 }
  0xca   : > { %1286 = vmatprep.mubr.bf16.mxu0 %v1532_v6 }
  0xd1   : > { %1287 = vmatmul.mubr.bf16.gmra.mrb[12].mxu0 %v1537_v7 }
  0xd2   : > { %1338 = vmatprep.mubr.bf16.mxu0 %v1488_v17 }
 0x18c   : > { %v1276_v11 = vpop.f32.mrb[0].mxu0 }
 0x18d   : > { %v514_v12 = vadd.f32 %v1276_v11, %v1162_v10  ;;  %v505_v13 = vpop.f32.mrb[1].mxu0  ;;  %v1413_v11 = vld [vmem:[%s1713_s4] sm:$0xff]  }
 0x18e   : > { %v506_v14 = vadd.f32 %v1162_v10, %v505_v13  ;;  %v1277_v15 = vpop.f32.mrb[2].mxu0  ;;  %1354 = vmatprep.subr.bf16.mxu1 %v1413_v11  ;;  %v1416_v13 = vld [vmem:[%s1713_s4 + $0x18] sm:$0xff]  }
 0x18f   : > { %v517_v16 = vadd.f32 %v1277_v15, %v1162_v10  ;;  %v508_v17 = vpop.f32.mrb[3].mxu0  ;;  %v570_v19 = vmax.f32 %v514_v12, 0.0  ;;  %v1414_v12 = vld [vmem:[%s1713_s4 + $0x8] sm:$0xff]  }
 0x190   : > { %v509_v18 = vadd.f32 %v1162_v10, %v508_v17  ;;  %v568_v21 = vmax.f32 %v506_v14, 0.0  ;;  %v1417_v14 = vld [vmem:[%s1713_s4 + $0x20] sm:$0xff]   ;;  %v1418_v15 = vld [vmem:[%s1713_s4 + $0x28] sm:$0xff]  }
 0x191   : > { %v571_v20 = vmax.f32 %v517_v16, 0.0 }
 0x192   : > { %v569_v22 = vmax.f32 %v509_v18, 0.0 }
 0x193   : > { %v585_v23 = vpack.c.bf16 %v571_v20, %v570_v19 }
 0x194   : > { %v1280_v24 = vpop.f32.mrb[4].mxu0  ;;  %v584_v25 = vpack.c.bf16 %v569_v22, %v568_v21 }
 0x195   : > { %v530_v26 = vadd.f32 %v1280_v24, %v1162_v10  ;;  %v521_v27 = vpop.f32.mrb[5].mxu0 }
 0x196   : > { %v522_v28 = vadd.f32 %v1162_v10, %v521_v27  ;;  %v1281_v29 = vpop.f32.mrb[6].mxu0  ;;  %1306 = vmatprep.mubr.bf16.mxu1 %v584_v25 }
 0x197   : > { %v533_v30 = vadd.f32 %v1281_v29, %v1162_v10  ;;  %v524_v31 = vpop.f32.mrb[7].mxu0  ;;  %1307 = vmatmul.mubr.bf16.vlgmr.msra.gmra.mrb[0].mxu1 %v585_v23  ;;  %v574_v33 = vmax.f32 %v530_v26, 0.0 }
 0x198   : > { %v525_v32 = vadd.f32 %v1162_v10, %v524_v31  ;;  %v572_v35 = vmax.f32 %v522_v28, 0.0  ;;  %1355 = vmatpush3.bf16.msra.mxu1 %v1413_v11 }
 0x199   : > { %v575_v34 = vmax.f32 %v533_v30, 0.0  ;;  %1356 = vmatprep.subr.bf16.mxu1 %v1414_v12 }
 0x19a   : > { %v573_v36 = vmax.f32 %v525_v32, 0.0 }
 0x19b   : > { %v587_v37 = vpack.c.bf16 %v575_v34, %v574_v33 }
 0x19c   : > { %v586_v38 = vpack.c.bf16 %v573_v36, %v572_v35  ;;  %v1284_v39 = vpop.f32.mrb[8].mxu0  ;;  %1357 = vmatpush3.bf16.msra.mxu1 %v1414_v12 }
 0x19d   : > { %v546_v40 = vadd.f32 %v1284_v39, %v1162_v10  ;;  %v537_v41 = vpop.f32.mrb[9].mxu0 }
 0x19e   : > { %v538_v42 = vadd.f32 %v1162_v10, %v537_v41  ;;  %v1285_v43 = vpop.f32.mrb[10].mxu0  ;;  %1310 = vmatprep.mubr.bf16.mxu1 %v586_v38 }
 0x19f   : > { %v549_v44 = vadd.f32 %v1285_v43, %v1162_v10  ;;  %v540_v45 = vpop.f32.mrb[11].mxu0  ;;  %1311 = vmatmul.mubr.bf16.gmra.mrb[4].mxu1 %v587_v37  ;;  %v578_v47 = vmax.f32 %v546_v40, 0.0  ;;  %v1419_v40 = vld [vmem:[%s1713_s4 + $0x30] sm:$0xff]  }
 0x1a0   : > { %v541_v46 = vadd.f32 %v1162_v10, %v540_v45  ;;  %v576_v49 = vmax.f32 %v538_v42, 0.0 }
 0x1a1   : > { %v579_v48 = vmax.f32 %v549_v44, 0.0 }
 0x1a2   : > { %v577_v50 = vmax.f32 %v541_v46, 0.0 }
 0x1a3   : > { %v589_v51 = vpack.c.bf16 %v579_v48, %v578_v47 }
 0x1a4   : > { %v588_v52 = vpack.c.bf16 %v577_v50, %v576_v49  ;;  %v1288_v53 = vpop.f32.mrb[12].mxu0 }
 0x1a5   : > { %v562_v54 = vadd.f32 %v1288_v53, %v1162_v10  ;;  %v553_v55 = vpop.f32.mrb[13].mxu0 }
 0x1a6   : > { %v554_v56 = vadd.f32 %v1162_v10, %v553_v55  ;;  %v1289_v57 = vpop.f32.mrb[14].mxu0  ;;  %1314 = vmatprep.mubr.bf16.mxu1 %v588_v52 }
 0x1a7   : > { %v565_v58 = vadd.f32 %v1289_v57, %v1162_v10  ;;  %v556_v59 = vpop.f32.mrb[15].mxu0  ;;  %1315 = vmatmul.mubr.bf16.gmra.mrb[8].mxu1 %v589_v51  ;;  %v582_v61 = vmax.f32 %v562_v54, 0.0 }
 0x1a8   : > { %v557_v60 = vadd.f32 %v1162_v10, %v556_v59  ;;  %v580_v63 = vmax.f32 %v554_v56, 0.0  ;;  %v1415_v10 = vld [vmem:[%s1713_s4 + $0x10] sm:$0xff]  }
 0x1a9   : > { %v583_v62 = vmax.f32 %v565_v58, 0.0  ;;  %1358 = vmatprep.subr.bf16.mxu1 %v1415_v10 }
 0x1aa   : > { %v581_v0 = vmax.f32 %v557_v60, 0.0  ;;  %1359 = vmatpush3.bf16.msra.mxu1 %v1415_v10 }
 0x1ab   : > { %v591_v8 = vpack.c.bf16 %v583_v62, %v582_v61  ;;  %1360 = vmatprep.subr.bf16.mxu1 %v1416_v13 }
 0x1ac   : > { %v590_v9 = vpack.c.bf16 %v581_v0, %v580_v63 }
 0x1ae   : > { %1318 = vmatprep.mubr.bf16.mxu1 %v590_v9  ;;  %1361 = vmatpush3.bf16.msra.mxu1 %v1416_v13 }
 0x1af   : > { %1319 = vmatmul.mubr.bf16.gmra.mrb[12].mxu1 %v591_v8  ;;  %1362 = vmatprep.subr.bf16.mxu1 %v1417_v14 }
 0x1b2   : > { %1363 = vmatpush3.bf16.msra.mxu1 %v1417_v14 }
 0x1b3   : > { %1364 = vmatprep.subr.bf16.mxu1 %v1418_v15 }
 0x1b6   : > { %1365 = vmatpush3.bf16.msra.mxu1 %v1418_v15 }
 0x1b7   : > { %1366 = vmatprep.subr.bf16.mxu1 %v1419_v40 }
 0x1ba   : > { %1367 = vmatpush3.bf16.msra.mxu1 %v1419_v40 }
 0x26a   : > { %v1308_v16 = vpop.f32.mrb[0].mxu1 }
 0x26b   : > { %v690_v17 = vpop.f32.mrb[1].mxu1 }
 0x26c   : > { %v1309_v18 = vpop.f32.mrb[2].mxu1 }
 0x26d   : > { %v754_v19 = vpack.c.bf16 %v1309_v18, %v1308_v16  ;;  %v693_v20 = vpop.f32.mrb[3].mxu1 }
 0x26e   : > { %v753_v21 = vpack.c.bf16 %v693_v20, %v690_v17 }
 0x270   : > { %1322 = vmatprep.subr.bf16.mxu0 %v753_v21 }
 0x271   : > { %1323 = vmatpush3.bf16.msra.mxu0 %v753_v21 }
 0x272   : > { %v1312_v22 = vpop.f32.mrb[4].mxu1  ;;  %1324 = vmatprep.subr.bf16.mxu0 %v754_v19 }
 0x273   : > { %v706_v23 = vpop.f32.mrb[5].mxu1 }
 0x274   : > { %v1313_v24 = vpop.f32.mrb[6].mxu1 }
 0x275   : > { %v756_v25 = vpack.c.bf16 %v1313_v24, %v1312_v22  ;;  %v709_v26 = vpop.f32.mrb[7].mxu1  ;;  %1325 = vmatpush3.bf16.msra.mxu0 %v754_v19 }
 0x276   : > { %v755_v27 = vpack.c.bf16 %v709_v26, %v706_v23 }
 0x278   : > { %1326 = vmatprep.subr.bf16.mxu0 %v755_v27 }
 0x279   : > { %1327 = vmatpush3.bf16.msra.mxu0 %v755_v27 }
 0x27a   : > { %v1316_v28 = vpop.f32.mrb[8].mxu1  ;;  %1328 = vmatprep.subr.bf16.mxu0 %v756_v25 }
 0x27b   : > { %v722_v29 = vpop.f32.mrb[9].mxu1 }
 0x27c   : > { %v1317_v30 = vpop.f32.mrb[10].mxu1 }
 0x27d   : > { %v758_v31 = vpack.c.bf16 %v1317_v30, %v1316_v28  ;;  %v725_v32 = vpop.f32.mrb[11].mxu1  ;;  %1329 = vmatpush3.bf16.msra.mxu0 %v756_v25 }
 0x27e   : > { %v757_v33 = vpack.c.bf16 %v725_v32, %v722_v29 }
 0x280   : > { %1330 = vmatprep.subr.bf16.mxu0 %v757_v33 }
 0x281   : > { %1331 = vmatpush3.bf16.msra.mxu0 %v757_v33 }
 0x282   : > { %v1320_v34 = vpop.f32.mrb[12].mxu1  ;;  %1332 = vmatprep.subr.bf16.mxu0 %v758_v31 }
 0x283   : > { %v738_v35 = vpop.f32.mrb[13].mxu1 }
 0x284   : > { %v1321_v36 = vpop.f32.mrb[14].mxu1 }
 0x285   : > { %v760_v37 = vpack.c.bf16 %v1321_v36, %v1320_v34  ;;  %v741_v38 = vpop.f32.mrb[15].mxu1  ;;  %1333 = vmatpush3.bf16.msra.mxu0 %v758_v31 }
 0x286   : > { %v759_v39 = vpack.c.bf16 %v741_v38, %v738_v35  ;;  %v1180_v35 = vld [vmem:[%s1714_s5 + $0x2] ss:$0 sm:$0xff] }
 0x288   : > { %1334 = vmatprep.subr.bf16.mxu0 %v759_v39 }
 0x289   : > { %1335 = vmatpush3.bf16.msra.mxu0 %v759_v39 }
 0x28a   : > { %1336 = vmatprep.subr.bf16.mxu0 %v760_v37 }
 0x28d   : > { %1337 = vmatpush3.bf16.msra.mxu0 %v760_v37 }
 0x290   : > { %1339 = vmatmul.mubr.bf16.vlgmr.msra.gmra.mrb[16].mxu0 %v1513_v1  ;;  %v1420_v1 = vld [vmem:[%s1713_s4 + $0x38] sm:$0xff]  }
 0x291   : > { %1342 = vmatprep.mubr.bf16.mxu0 %v1516_v2  ;;  %1368 = vmatprep.subr.bf16.mxu1 %v1420_v1  ;;  %v1179_v2 = vld [vmem:[%s1714_s5 + $0x1] ss:$0 sm:$0xff] }
 0x292   : > { %1369 = vmatpush3.bf16.msra.mxu1 %v1420_v1 }
 0x298   : > { %1343 = vmatmul.mubr.bf16.gmra.mrb[20].mxu0 %v1521_v3 }
 0x299   : > { %1346 = vmatprep.mubr.bf16.mxu0 %v1524_v4 }
 0x2a0   : > { %1347 = vmatmul.mubr.bf16.gmra.mrb[24].mxu0 %v1529_v5 }
 0x2a1   : > { %1350 = vmatprep.mubr.bf16.mxu0 %v1532_v6 }
 0x2a8   : > { %1351 = vmatmul.mubr.bf16.gmra.mrb[28].mxu0 %v1537_v7 }
 0x363   : > { %v1340_v3 = vpop.f32.mrb[16].mxu0 }
 0x364   : > { %v799_v4 = vpop.f32.mrb[17].mxu0  ;;  %v1586_v7 = vadd.f32 %v1340_v3, %v1179_v2 }
 0x365   : > { %v1584_v5 = vadd.f32 %v1179_v2, %v799_v4  ;;  %v1341_v6 = vpop.f32.mrb[18].mxu0 }
 0x366   : > { %v1588_v41 = vadd.f32 %v1341_v6, %v1179_v2  ;;  %v802_v42 = vpop.f32.mrb[19].mxu0  ;;  %v864_v47 = vmax.f32 %v1586_v7, 0.0 }
 0x367   : > { %v1590_v43 = vadd.f32 %v1179_v2, %v802_v42  ;;  %v862_v45 = vmax.f32 %v1584_v5, 0.0 }
 0x368   : > { %v865_v44 = vmax.f32 %v1588_v41, 0.0 }
 0x369   : > { %v863_v46 = vmax.f32 %v1590_v43, 0.0 }
 0x36a   : > { %v879_v50 = vpack.c.bf16 %v865_v44, %v864_v47 }
 0x36b   : > { %v878_v48 = vpack.c.bf16 %v863_v46, %v862_v45  ;;  %v1344_v49 = vpop.f32.mrb[20].mxu0 }
 0x36c   : > { %v815_v51 = vpop.f32.mrb[21].mxu0  ;;  %v1604_v54 = vadd.f32 %v1344_v49, %v1179_v2 }
 0x36d   : > { %v1602_v52 = vadd.f32 %v1179_v2, %v815_v51  ;;  %v1345_v53 = vpop.f32.mrb[22].mxu0  ;;  %1370 = vmatprep.mubr.bf16.mxu1 %v878_v48 }
 0x36e   : > { %v1606_v55 = vadd.f32 %v1345_v53, %v1179_v2  ;;  %v818_v56 = vpop.f32.mrb[23].mxu0  ;;  %1371 = vmatmul.mubr.bf16.vlgmr.msra.gmra.mrb[16].mxu1 %v879_v50  ;;  %v868_v61 = vmax.f32 %v1604_v54, 0.0 }
 0x36f   : > { %v1608_v57 = vadd.f32 %v1179_v2, %v818_v56  ;;  %v866_v59 = vmax.f32 %v1602_v52, 0.0 }
 0x370   : > { %v869_v58 = vmax.f32 %v1606_v55, 0.0 }
 0x371   : > { %v867_v60 = vmax.f32 %v1608_v57, 0.0 }
 0x372   : > { %v881_v0 = vpack.c.bf16 %v869_v58, %v868_v61 }
 0x373   : > { %v880_v62 = vpack.c.bf16 %v867_v60, %v866_v59  ;;  %v1348_v63 = vpop.f32.mrb[24].mxu0 }
 0x374   : > { %v831_v8 = vpop.f32.mrb[25].mxu0  ;;  %v1622_v12 = vadd.f32 %v1348_v63, %v1179_v2 }
 0x375   : > { %v1620_v9 = vadd.f32 %v1179_v2, %v831_v8  ;;  %v1349_v11 = vpop.f32.mrb[26].mxu0  ;;  %1374 = vmatprep.mubr.bf16.mxu1 %v880_v62 }
 0x376   : > { %v1624_v10 = vadd.f32 %v1349_v11, %v1179_v2  ;;  %v834_v13 = vpop.f32.mrb[27].mxu0  ;;  %1375 = vmatmul.mubr.bf16.gmra.mrb[20].mxu1 %v881_v0  ;;  %v872_v18 = vmax.f32 %v1622_v12, 0.0 }
 0x377   : > { %v1626_v14 = vadd.f32 %v1179_v2, %v834_v13  ;;  %v870_v16 = vmax.f32 %v1620_v9, 0.0 }
 0x378   : > { %v873_v15 = vmax.f32 %v1624_v10, 0.0 }
 0x379   : > { %v871_v17 = vmax.f32 %v1626_v14, 0.0 }
 0x37a   : > { %v883_v21 = vpack.c.bf16 %v873_v15, %v872_v18 }
 0x37b   : > { %v882_v19 = vpack.c.bf16 %v871_v17, %v870_v16  ;;  %v1352_v20 = vpop.f32.mrb[28].mxu0 }
 0x37c   : > { %v847_v22 = vpop.f32.mrb[29].mxu0  ;;  %v1640_v25 = vadd.f32 %v1352_v20, %v1179_v2 }
 0x37d   : > { %v1638_v23 = vadd.f32 %v1179_v2, %v847_v22  ;;  %v1353_v24 = vpop.f32.mrb[30].mxu0  ;;  %1378 = vmatprep.mubr.bf16.mxu1 %v882_v19 }
 0x37e   : > { %v1642_v26 = vadd.f32 %v1353_v24, %v1179_v2  ;;  %v850_v27 = vpop.f32.mrb[31].mxu0  ;;  %1379 = vmatmul.mubr.bf16.gmra.mrb[24].mxu1 %v883_v21  ;;  %v876_v32 = vmax.f32 %v1640_v25, 0.0 }
 0x37f   : > { %v1644_v28 = vadd.f32 %v1179_v2, %v850_v27  ;;  %v874_v30 = vmax.f32 %v1638_v23, 0.0 }
 0x380   : > { %v877_v29 = vmax.f32 %v1642_v26, 0.0 }
 0x381   : > { %v875_v31 = vmax.f32 %v1644_v28, 0.0 }
 0x382   : > { %v885_v34 = vpack.c.bf16 %v877_v29, %v876_v32 }
 0x383   : > { %v884_v33 = vpack.c.bf16 %v875_v31, %v874_v30 }
 0x385   : > { %1382 = vmatprep.mubr.bf16.mxu1 %v884_v33 }
 0x386   : > { %1383 = vmatmul.mubr.bf16.gmra.mrb[28].mxu1 %v885_v34 }
 0x441   : > { %v1372_v36 = vpop.f32.mrb[16].mxu1 }
 0x442   : > { %v997_v37 = vadd.f32 %v1372_v36, %v1180_v35  ;;  %v988_v38 = vpop.f32.mrb[17].mxu1 }
 0x443   : > { %v989_v39 = vadd.f32 %v1180_v35, %v988_v38  ;;  %v1373_v40 = vpop.f32.mrb[18].mxu1 }
 0x444   : > { %v1053_v1 = vadd.f32 %v997_v37, %v864_v47  ;;  %v1000_v2 = vadd.f32 %v1373_v40, %v1180_v35  ;;  %v991_v3 = vpop.f32.mrb[19].mxu1 }
 0x445   : > { %v1051_v4 = vadd.f32 %v989_v39, %v862_v45  ;;  %v992_v6 = vadd.f32 %v1180_v35, %v991_v3 }
 0x446   : > { %1069 = vst [vmem:[%s1664_s7 + $0x10] sm:$0xff] %v1053_v1  ;;  %v1054_v7 = vadd.f32 %v1000_v2, %v865_v44 }
 0x447   : > { %1067 = vst [vmem:[%s1664_s7] sm:$0xff] %v1051_v4  ;;  %v1052_v42 = vadd.f32 %v992_v6, %v863_v46 }
 0x448   : > { %1070 = vst [vmem:[%s1664_s7 + $0x18] sm:$0xff] %v1054_v7 }
 0x449   : > { %1068 = vst [vmem:[%s1664_s7 + $0x8] sm:$0xff] %v1052_v42  ;;  %v1376_v47 = vpop.f32.mrb[20].mxu1 }
 0x44a   : > { %v1013_v48 = vadd.f32 %v1376_v47, %v1180_v35  ;;  %v1004_v49 = vpop.f32.mrb[21].mxu1 }
 0x44b   : > { %v1005_v5 = vadd.f32 %v1180_v35, %v1004_v49  ;;  %v1377_v45 = vpop.f32.mrb[22].mxu1 }
 0x44c   : > { %v1057_v50 = vadd.f32 %v1013_v48, %v868_v61  ;;  %v1016_v51 = vadd.f32 %v1377_v45, %v1180_v35  ;;  %v1007_v53 = vpop.f32.mrb[23].mxu1 }
 0x44d   : > { %v1055_v41 = vadd.f32 %v1005_v5, %v866_v59  ;;  %v1008_v44 = vadd.f32 %v1180_v35, %v1007_v53 }
 0x44e   : > { %1073 = vst [vmem:[%s1664_s7 + $0x30] sm:$0xff] %v1057_v50  ;;  %v1058_v43 = vadd.f32 %v1016_v51, %v869_v58 }
 0x44f   : > { %1071 = vst [vmem:[%s1664_s7 + $0x20] sm:$0xff] %v1055_v41  ;;  %v1056_v46 = vadd.f32 %v1008_v44, %v867_v60 }
 0x450   : > { %1074 = vst [vmem:[%s1664_s7 + $0x38] sm:$0xff] %v1058_v43 }
 0x451   : > { %1072 = vst [vmem:[%s1664_s7 + $0x28] sm:$0xff] %v1056_v46  ;;  %v1380_v54 = vpop.f32.mrb[24].mxu1 }
 0x452   : > { %v1029_v56 = vadd.f32 %v1380_v54, %v1180_v35  ;;  %v1020_v61 = vpop.f32.mrb[25].mxu1 }
 0x453   : > { %v1021_v52 = vadd.f32 %v1180_v35, %v1020_v61  ;;  %v1381_v59 = vpop.f32.mrb[26].mxu1 }
 0x454   : > { %v1061_v62 = vadd.f32 %v1029_v56, %v872_v18  ;;  %v1032_v63 = vadd.f32 %v1381_v59, %v1180_v35  ;;  %v1023_v0 = vpop.f32.mrb[27].mxu1 }
 0x455   : > { %v1059_v55 = vadd.f32 %v1021_v52, %v870_v16  ;;  %v1024_v58 = vadd.f32 %v1180_v35, %v1023_v0 }
 0x456   : > { %1077 = vst [vmem:[%s1664_s7 + $0x50] sm:$0xff] %v1061_v62  ;;  %v1062_v57 = vadd.f32 %v1032_v63, %v873_v15 }
 0x457   : > { %1075 = vst [vmem:[%s1664_s7 + $0x40] sm:$0xff] %v1059_v55  ;;  %v1060_v60 = vadd.f32 %v1024_v58, %v871_v17 }
 0x458   : > { %1078 = vst [vmem:[%s1664_s7 + $0x58] sm:$0xff] %v1062_v57 }
 0x459   : > { %1076 = vst [vmem:[%s1664_s7 + $0x48] sm:$0xff] %v1060_v60  ;;  %v1384_v8 = vpop.f32.mrb[28].mxu1 }
 0x45a   : > { %v1045_v11 = vadd.f32 %v1384_v8, %v1180_v35  ;;  %v1036_v12 = vpop.f32.mrb[29].mxu1 }
 0x45b   : > { %v1037_v9 = vadd.f32 %v1180_v35, %v1036_v12  ;;  %v1385_v13 = vpop.f32.mrb[30].mxu1 }
 0x45c   : > { %v1065_v16 = vadd.f32 %v1045_v11, %v876_v32  ;;  %v1048_v18 = vadd.f32 %v1385_v13, %v1180_v35  ;;  %v1039_v19 = vpop.f32.mrb[31].mxu1 }
 0x45d   : > { %v1063_v10 = vadd.f32 %v1037_v9, %v874_v30  ;;  %v1040_v15 = vadd.f32 %v1180_v35, %v1039_v19 }
 0x45e   : > { %1081 = vst [vmem:[%s1664_s7 + $0x70] sm:$0xff] %v1065_v16  ;;  %v1066_v14 = vadd.f32 %v1048_v18, %v877_v29 }
 0x45f   : > { %1079 = vst [vmem:[%s1664_s7 + $0x60] sm:$0xff] %v1063_v10  ;;  %v1064_v17 = vadd.f32 %v1040_v15, %v875_v31 }
 0x460   : > { %1082 = vst [vmem:[%s1664_s7 + $0x78] sm:$0xff] %v1066_v14 }
 0x461   : > { %1080 = vst [vmem:[%s1664_s7 + $0x68] sm:$0xff] %v1064_v17 }
 0x462 PF: > { %s16_s21 = sadd.s32 1, %s1427_s21  }
 0x463   : > { %p13_p4 = scmp.ge.s32.totalorder %s16_s21, 6  }
 0x465   :  { %15 = sbr.rel (!%p13_p4) target bundleno = 1 (0x1), region = 77 }

</bundles_post_ra>
